<compile_context>
chip_gen: v7x
topology: tpu7x:2x2x1
jax: 0.10.0
libtpu: 0.0.40
codegen_flags: <defaults>
</compile_context>

<pallas_src>
import jax
import jax.numpy as jnp
from jax.experimental import pallas as pl
from jax.experimental.pallas import tpu as pltpu


def _round_up(x, m):
    return ((x + m - 1) // m) * m


def gated_attn_u_kernel(f_ref, w_ref, b_ref, o_ref):
    # f_ref: (TN, D) native dtype    w_ref: (A_pad, D) bf16 (nn.Linear layout)
    # b_ref: (1, A_pad) f32          o_ref: (TN, A_pad) out dtype (bf16)
    f = f_ref[...].astype(w_ref.dtype)          # in-kernel cast: free under DMA
    logits = jax.lax.dot_general(               # contract last dims: f @ W.T
        f, w_ref[...],
        dimension_numbers=(((1,), (1,)), ((), ())),
        preferred_element_type=jnp.float32)     # MXU, f32 accumulation
    logits = logits + b_ref[...]                # f32 bias add (VPU)
    o_ref[...] = jax.nn.sigmoid(logits).astype(o_ref.dtype)  # f32 sigmoid (EUP)


def gated_attention_layer_u(features, w_u, b_u, *, out_dtype=jnp.bfloat16,
                            mxu_dtype=jnp.bfloat16, tile_n=None):
    """sigmoid(features @ w_u.T + b_u) via a row-tiled Pallas TPU kernel."""
    N, D = features.shape
    A, D2 = w_u.shape
    assert D == D2, "feature dim mismatch"

    # Lane-dense output: pad A to a multiple of 128 (zeros), slice after.
    A_pad = _round_up(A, 128)
    w = w_u.astype(mxu_dtype)                     # tiny (A*D*2B); constant-folds under jit
    b = b_u.astype(jnp.float32)
    if A_pad != A:
        w = jnp.pad(w, ((0, A_pad - A), (0, 0)))
        b = jnp.pad(b, (0, A_pad - A))
    b2d = b.reshape(1, A_pad)

    feat_bytes = jnp.dtype(features.dtype).itemsize
    out_bytes = jnp.dtype(out_dtype).itemsize
    w_bytes = jnp.dtype(mxu_dtype).itemsize

    if tile_n is None:
        # VMEM budget: double-buffered feature + output tiles, resident weight/bias.
        per_row = 2 * D * feat_bytes + 2 * A_pad * out_bytes
        fixed = 2 * (D * A_pad * w_bytes + A_pad * 4)
        budget = 24 << 20
        vmem_rows = max(16, ((budget - fixed) // per_row) // 16 * 16)
        tile_n = min(1024, vmem_rows, _round_up(N, 16))
        # v7x megacore: prefer >=2 balanced grid steps so both TCs get rows.
        half = _round_up(-(-N // 2), 16)
        if N > half:
            tile_n = min(tile_n, half)

    grid = (pl.cdiv(N, tile_n),)

    cost = pl.CostEstimate(
        flops=2 * N * D * A_pad,
        transcendentals=N * A_pad,
        bytes_accessed=(N * D * feat_bytes + A_pad * D * w_bytes
                        + N * A_pad * out_bytes + A_pad * 4),
    )

    out = pl.pallas_call(
        gated_attn_u_kernel,
        out_shape=jax.ShapeDtypeStruct((N, A_pad), out_dtype),
        grid_spec=pl.GridSpec(
            grid=grid,
            in_specs=[
                pl.BlockSpec((tile_n, D), lambda i: (i, 0)),   # feature row tile
                pl.BlockSpec((A_pad, D),  lambda i: (0, 0)),   # full weight, resident
                pl.BlockSpec((1, A_pad),  lambda i: (0, 0)),   # bias row, resident
            ],
            out_specs=pl.BlockSpec((tile_n, A_pad), lambda i: (i, 0)),
        ),
        compiler_params=pltpu.CompilerParams(
            dimension_semantics=("parallel",),   # row axis independent -> v7x TC split
            vmem_limit_bytes=32 << 20),          # v5e default scoped limit is 16 MiB
        cost_estimate=cost,
    )(features, w, b2d)

    return out if A_pad == A else out[:, :A]


if __name__ == "__main__":
    # Deterministic synthetic parameters / inputs (no checkpoint loading).
    key = jax.random.PRNGKey(0)
    k_f, k_w, k_b = jax.random.split(key, 3)

    N, D, A = 64, 256, 128     # small bag of instances, feature dim, gate width

    features = jax.random.normal(k_f, (N, D), dtype=jnp.float32)
    # nn.Linear-style init scale 1/sqrt(D)
    W_U = jax.random.uniform(k_w, (A, D), jnp.float32, -1.0, 1.0) / jnp.sqrt(D)
    b_U = jax.random.uniform(k_b, (A,), jnp.float32, -1.0, 1.0) / jnp.sqrt(D)

    out = jax.block_until_ready(gated_attention_layer_u(features, W_U, b_U))
    assert out.shape == (N, A) and out.dtype == jnp.bfloat16

    # Reference with the SAME bf16 MXU operands + f32 accumulation as the kernel.
    ref_logits = jax.lax.dot_general(
        features.astype(jnp.bfloat16), W_U.astype(jnp.bfloat16),
        dimension_numbers=(((1,), (1,)), ((), ())),
        preferred_element_type=jnp.float32) + b_U
    ref = jax.nn.sigmoid(ref_logits)
    assert jnp.allclose(out.astype(jnp.float32), ref, atol=1e-2, rtol=1e-2)

    # Looser sanity check vs. full-f32 torch-equivalent math (bf16 quantization only).
    ref_f32 = jax.nn.sigmoid(features @ W_U.T + b_U)
    assert jnp.allclose(out.astype(jnp.float32), ref_f32, atol=2e-2, rtol=2e-2)

    # Non-aligned shapes: exercises A padding (64 -> 128 lanes), partial row tile,
    # and the 2-step balanced grid path.
    N2, A2 = 50, 64
    f2 = jax.random.normal(k_f, (N2, D), dtype=jnp.float32)
    W2 = jax.random.uniform(k_w, (A2, D), jnp.float32, -1.0, 1.0) / jnp.sqrt(D)
    b2 = jax.random.uniform(k_b, (A2,), jnp.float32, -1.0, 1.0) / jnp.sqrt(D)
    out2 = jax.block_until_ready(gated_attention_layer_u(f2, W2, b2))
    assert out2.shape == (N2, A2)
    ref2 = jax.nn.sigmoid(f2 @ W2.T + b2)
    assert jnp.allclose(out2.astype(jnp.float32), ref2, atol=2e-2, rtol=2e-2)

    print("KERNEL_OK")
</pallas_src>

<mosaic_0001>
module attributes {stable_mosaic.version = 11 : i64} {
  func.func @gated_attn_u_kernel(%arg0: i32, %arg1: memref<32x256xf32, #tpu.memory_space<vmem>>, %arg2: memref<128x256xbf16, #tpu.memory_space<vmem>>, %arg3: memref<1x128xf32, #tpu.memory_space<vmem>>, %arg4: memref<32x128xbf16, #tpu.memory_space<vmem>>) attributes {dimension_semantics = [#tpu.dimension_semantics<parallel>], iteration_bounds = array<i64: 2>, scalar_prefetch = 0 : i64, scratch_operands = 0 : i64, tpu.core_type = #tpu.core_type<tc>, window_params = [{transform_indices = @transform_0, window_bounds = array<i64: 32, 256>}, {pipeline_mode = #tpu.pipeline_mode<synchronous>, transform_indices = @transform_1, window_bounds = array<i64: 128, 256>}, {pipeline_mode = #tpu.pipeline_mode<synchronous>, transform_indices = @transform_2, window_bounds = array<i64: 1, 128>}, {transform_indices = @transform_3, window_bounds = array<i64: 32, 128>}]} {
    %c0 = arith.constant 0 : index
    %c0_0 = arith.constant 0 : index
    %0 = vector.load %arg1[%c0, %c0_0] : memref<32x256xf32, #tpu.memory_space<vmem>>, vector<32x256xf32>
    %1 = arith.truncf %0 : vector<32x256xf32> to vector<32x256xbf16>
    %c0_1 = arith.constant 0 : index
    %c0_2 = arith.constant 0 : index
    %2 = vector.load %arg2[%c0_1, %c0_2] : memref<128x256xbf16, #tpu.memory_space<vmem>>, vector<128x256xbf16>
    %cst = arith.constant dense<0.000000e+00> : vector<32x128xf32>
    %3 = tpu.matmul %1, %2, %cst {dimension_numbers = #tpu.dot_dimension_numbers<[1], [1], [0], [0], [0, 0, 1, 0], [], []>} : vector<32x256xbf16>, vector<128x256xbf16>, vector<32x128xf32> -> vector<32x128xf32>
    %c0_3 = arith.constant 0 : index
    %c0_4 = arith.constant 0 : index
    %4 = vector.load %arg3[%c0_3, %c0_4] : memref<1x128xf32, #tpu.memory_space<vmem>>, vector<1x128xf32>
    %5 = vector.broadcast %4 : vector<1x128xf32> to vector<32x128xf32>
    %6 = arith.addf %3, %5 : vector<32x128xf32>
    %7 = arith.negf %6 : vector<32x128xf32>
    %8 = math.exp %7 : vector<32x128xf32>
    %cst_5 = arith.constant 1.000000e+00 : f32
    %9 = vector.broadcast %cst_5 : f32 to vector<32x128xf32>
    %10 = arith.addf %9, %8 : vector<32x128xf32>
    %11 = arith.divf %9, %10 : vector<32x128xf32>
    %12 = arith.truncf %11 : vector<32x128xf32> to vector<32x128xbf16>
    %c0_6 = arith.constant 0 : index
    %c0_7 = arith.constant 0 : index
    %13 = vector.load %arg4[%c0_6, %c0_7] : memref<32x128xbf16, #tpu.memory_space<vmem>>, vector<32x128xbf16>
    tpu.vector_store %arg4[%c0_6, %c0_7], %12 {strides = array<i32>} : memref<32x128xbf16, #tpu.memory_space<vmem>>, vector<32x128xbf16>,
    return
  }
  func.func @transform_0(%arg0: i32) -> (i32, i32) {
    %c0_i32 = arith.constant 0 : i32
    %c0_i32_0 = arith.constant 0 : i32
    return %arg0, %c0_i32 : i32, i32
  }
  func.func @transform_1(%arg0: i32) -> (i32, i32) {
    %c0_i32 = arith.constant 0 : i32
    %c0_i32_0 = arith.constant 0 : i32
    %c0_i32_1 = arith.constant 0 : i32
    return %c0_i32, %c0_i32_0 : i32, i32
  }
  func.func @transform_2(%arg0: i32) -> (i32, i32) {
    %c0_i32 = arith.constant 0 : i32
    %c0_i32_0 = arith.constant 0 : i32
    %c0_i32_1 = arith.constant 0 : i32
    return %c0_i32, %c0_i32_0 : i32, i32
  }
  func.func @transform_3(%arg0: i32) -> (i32, i32) {
    %c0_i32 = arith.constant 0 : i32
    %c0_i32_0 = arith.constant 0 : i32
    return %arg0, %c0_i32 : i32, i32
  }
}

</mosaic_0001>

<bundles_post_ra>
// kernel: tpu_custom_call.1
= control target key start
LH: loop header
LB: loop body
LE: loop exit
PB: predicated region body
PF: predicated region fallthrough
CT: control target
= control target key end

     0   :  { %8 = vsyncpa [#allocation3], 0  ;;  %s1066_s0 = inlined_call_operand.hbm [shape: f32[64,256], index: 0, kind: input, shape index: {}]   ;;  %s1067_s1 = inlined_call_operand.hbm [shape: bf16[128,256], index: 1, kind: input, shape index: {}]   ;;  %s1068_s2 = inlined_call_operand.vmem [shape: f32[1,128], index: 2, kind: input, shape index: {}]   ;;  %s1069_s3 = inlined_call_operand.hbm [shape: bf16[64,128], index: 3, kind: output, shape index: {}]  }
   0x1   :  { %10 = vsyncpa [#allocation3 + $0x1], 0 }
   0x2   :  { %11 = vsyncpa [#allocation6], 0 }
   0x3   :  { %12 = vsyncpa [#allocation4], 0 }
   0x4   :  { %14 = vsyncpa [#allocation4 + $0x1], 0  ;;  %s851_s12 = smov 0   ;;  %s853_s13 = smov 0  }
   0x5   :  { %s855_s14 = smov 0   ;;  %s857_s15 = smov 0  }
   0x6 LB: > { %s872_s16 = sadd.s32 4294967295, %s820_s15   ;;  %s513_s17 = sadd.s32 4294967294, %s820_s15   ;;  %s820_s15 = sphi %s857_s15, %s1089_s15   ;;  %s816_s14 = sphi %s855_s14, %s1088_s14   ;;  %s812_s13 = sphi %s853_s13, %s1087_s13   ;;  %s808_s12 = sphi %s851_s12, %s1086_s12  }
   0x7   : > { %p40_p0 = scmp.ne.s32.totalorder %s812_s13, %s808_s12  ;;  %p1070_p1 = scmp.eq.s32.totalorder %s872_s16, 0 }
   0x8   : > { %p112_p3 = scmp.eq.s32.totalorder %s513_s17, 1  ;;  %p514_p5 = scmp.ge.s32.totalorder %s820_s15, 1 }
   0x9   : > { %p881_p4 = por %p1070_p1, %p40_p0  ;;  %p119_p7 = scmp.lt.s32.totalorder %s820_s15, 3 }
   0xa   : > { %p886_p6 = por %p112_p3, %p40_p0  ;;  %s822_s21 = smov [#allocation5]  }
   0xb   : > { %s1073_s18 = scalar_select %p881_p4, 1, 0 }
   0xc   : > { %s1074_s19 = scalar_select %p886_p6, 1, 0 }
   0xd   : > { %p891_p8 = pnand %p514_p5, %p119_p7  ;;  %s131_s22 = sshll.u32 %s822_s21, 4  ;;  %s895_s22 = int_to_ptr.vmem [resolvable:$true] %s131_s22 }
   0xe   : > { %s907_s24 = sadd.s32 1, %s820_s15   ;;  %s27_s25 = sadd.s32 1, %s816_s14 }
   0xf   : > { %s1075_s20 = scalar_select %p891_p8, 1, 0 }
  0x10   : > { %p597_p9 = pneg %p891_p8  ;;  %s24_s26 = ssub.s32 %s820_s15, %s907_s24 }
  0x11   : > { %s692_s29 = scalar_lea.hbm %s1067_s1, 2048 }
  0x12   : > { %p902_p11 = pnand %p597_p9, %p1070_p1  ;;  %p693_p12 = scmp.ne.s32.totalorder %s1067_s1, %s692_s29 }
  0x13   : > { %p699_p5 = scmp.lt.u32.totalorder %s692_s29, %s1067_s1 }
  0x14   : > { %p694_p13 = pneg %p902_p11 }
  0x16   : > { %p695_p0 = pnand %p694_p13, %p693_p12 }
  0x18   : > { %p696_p3 = pneg %p695_p0 }
  0x1a   : > { %p701_p7 = pnand %p699_p5, %p696_p3 }
  0x1c   : > { %704 = shalt.err (!%p701_p7)
}
  0x1d   : > { %s705_s7 = scalar_lea.vmem %s895_s22, 2048  ;;  %p713_p2 = scmp.lt.s32.totalorder %s895_s22, %s895_s22 }
  0x1e   : > { %p706_p9 = scmp.ne.s32.totalorder %s895_s22, %s705_s7  ;;  %p714_p6 = scmp.lt.s32.totalorder %s705_s7, %s705_s7 }
  0x20   : > { %p708_p10 = pnand %p706_p9, %p694_p13  ;;  %p715_p4 = por %p714_p6, %p713_p2 }
  0x22   : > { %p709_p1 = pneg %p708_p10 }
  0x24   : > { %p716_p8 = pnand %p715_p4, %p709_p1 }
  0x26   : > { %719 = shalt.err (!%p716_p8)
}
  0x27   : > { %s823_s8 = smov 128   ;;  %s824_s9 = smov 8  }
  0x28   : > { %600 = dma.hbm_to_vmem [thread:$0]  (!%p902_p11), %s1067_s1, 2048, %s895_s22, [#allocation6], %s823_s8, %s823_s8, %s824_s9  }
  0x29   : > { %p25_p2 = scmp.eq.s32.totalorder %s24_s26, 0  ;;  %p34_p1 = scmp.ne.s32.totalorder %s816_s14, %s812_s13 }
  0x2a   : > { %p35_p4 = scmp.eq.s32.totalorder %s820_s15, 0  ;;  %p610_p6 = scmp.lt.s32.totalorder %s820_s15, 2 }
  0x2b   : > { %s938_s17 = scalar_select %p25_p2, %s816_s14, %s27_s25  }
  0x2c   : > { %p36_p8 = por %p35_p4, %p34_p1  ;;  %p1077_p10 = scmp.eq.s32.totalorder %s872_s16, 1 }
  0x2d   : > { %s148_s27 = sand.u32 1, %s816_s14   ;;  %s556_s28 = sshll.u32 %s820_s15, 10 }
  0x2e   : > { %p942_p12 = por %p1077_p10, %p34_p1  ;;  %s517_s29 = sshll.u32 %s148_s27, 6 }
  0x2f   : > { %s951_s4 = scalar_lea.hbm %s1066_s0, %s556_s28  ;;  %s152_s22 = scalar_lea.vmem [#allocation2], %s517_s29 }
  0x30   : > { %s160_s25 = sshll.u32 %s152_s22, 4  ;;  %p953_p11 = pnand %p610_p6, %p36_p8  ;;  %s957_s25 = int_to_ptr.vmem [resolvable:$true] %s160_s25 }
  0x31   : > { %s959_s5 = scalar_lea.sflag [#allocation3], %s148_s27  ;;  %s720_s6 = scalar_lea.hbm %s951_s4, 1024 }
  0x32   : > { %p721_p13 = scmp.ne.s32.totalorder %s951_s4, %s720_s6  ;;  %p722_p0 = pneg %p953_p11 }
  0x33   : > { %s725_s9 = scalar_lea.hbm %s1066_s0, 2048  ;;  %p726_p7 = scmp.lt.u32.totalorder %s951_s4, %s1066_s0 }
  0x34   : > { %p723_p3 = pnand %p722_p0, %p721_p13  ;;  %p727_p9 = scmp.lt.u32.totalorder %s725_s9, %s720_s6 }
  0x35   : > { %p729_p1 = scmp.lt.u32.totalorder %s720_s6, %s951_s4 }
  0x36   : > { %p724_p5 = pneg %p723_p3  ;;  %p728_p2 = por %p727_p9, %p726_p7 }
  0x38   : > { %p730_p4 = por %p729_p1, %p728_p2 }
  0x3a   : > { %p731_p6 = pnand %p730_p4, %p724_p5 }
  0x3c   : > { %734 = shalt.err (!%p731_p6)
}
  0x3d   : > { %s735_s27 = scalar_lea.vmem %s957_s25, 1024  ;;  %s825_s28 = smov [#allocation2]  }
  0x3e   : > { %p736_p8 = scmp.ne.s32.totalorder %s957_s25, %s735_s27  ;;  %s740_s29 = sshll.u32 %s825_s28, 4  ;;  %s741_s29 = int_to_ptr.vmem [resolvable:$false] %s740_s29 }
  0x3f   : > { %s742_s23 = scalar_lea.vmem %s741_s29, 2048  ;;  %p743_p3 = scmp.lt.s32.totalorder %s957_s25, %s741_s29 }
  0x40   : > { %p738_p10 = pnand %p736_p8, %p722_p0  ;;  %p744_p7 = scmp.lt.s32.totalorder %s742_s23, %s735_s27 }
  0x42   : > { %p739_p13 = pneg %p738_p10  ;;  %p745_p9 = por %p744_p7, %p743_p3 }
  0x44   : > { %p746_p2 = pnand %p745_p9, %p739_p13 }
  0x46   : > { %749 = shalt.err (!%p746_p2)
}
  0x47   : > { %s826_s30 = smov 256   ;;  %s827_s22 = smov 16  }
  0x48   : > { %604 = dma.hbm_to_vmem [thread:$0]  (!%p953_p11), %s951_s4, 1024, %s957_s25, %s959_s5, %s826_s30, %s826_s30, %s827_s22  }
  0x49   : > { %p1080_p0 = scmp.ne.s32.totalorder %s1075_s20, 0 }
  0x4a   : > { %s990_s6 = sand.u32 (!%p1080_p0), 1, %s812_s13   ;;  %p1081_p5 = scmp.ne.s32.totalorder (!%p1080_p0), %s1073_s18, 0 }
  0x4b   : > { %172 = sbr.rel (%p1080_p0) target bundleno = 411 (0x19b), region = 32  ;;  %s522_s7 = sshll.u32 (!%p1080_p0), %s990_s6, 6 }
  0x4c   : > { %s175_s8 = scalar_lea.sflag (!%p1080_p0), [#allocation3], %s990_s6  ;;  %s994_s9 = scalar_lea.vmem (!%p1080_p0), [#allocation2], %s522_s7 }
  0x52   : > { %795 = dma.done.wait (%p1081_p5), %s175_s8, 1024  }
  0x53   : > { %797 = vsyncadd (%p1081_p5), %s175_s8, 4294966272  ;;  %p1082_p11 = scmp.eq.s32.totalorder %s872_s16, 0 }
  0x55   : > { %799 = dma.done.wait (%p1082_p11), [#allocation6], 2048   ;;  %p1083_p1 = pmov %p1082_p11 }
  0x56   : > { %v652_v0 = vld [vmem:[#allocation5 + $0x4] ss:$8 sps:$4 sm:$0xff]   ;;  %v654_v1 = vld [vmem:[#allocation5] ss:$8 sps:$4 sm:$0xff]   ;;  %v655_v2 = vld [vmem:[#allocation5 + $0x14] ss:$8 sps:$4 sm:$0xff]  }
  0x57   : > { %801 = vsyncadd (%p1083_p1), [#allocation6], 4294965248  ;;  %323 = vmatprep.subr.bf16.mxu0 %v652_v0  ;;  %573 = vmatprep.subr.bf16.mxu1 %v652_v0  ;;  %v657_v3 = vld [vmem:[#allocation5 + $0x10] ss:$8 sps:$4 sm:$0xff]   ;;  %v658_v4 = vld [vmem:[#allocation5 + $0x24] ss:$8 sps:$4 sm:$0xff]  }
  0x58   : > { %324 = vmatpush1.bf16.xpose.msra.mxu0 %v654_v1  ;;  %581 = vmatpush1.bf16.xpose.msra.mxu1 %v654_v1  ;;  %v209_v5 = vld [vmem:[%s994_s9 + $0x8] sm:$0xff]  ;;  %v211_v6 = vld [vmem:[%s994_s9 + $0x18] sm:$0xff]  ;;  %v208_v22 = vld [vmem:[%s994_s9] sm:$0xff]  ;;  %s524_s4 = sshll.u32 %s990_s6, 4  ;;  %s561_s25 = sshll.u32 %s872_s16, 8 }
  0x59   : > { %325 = vmatprep.subr.bf16.mxu0 %v655_v2  ;;  %574 = vmatprep.subr.bf16.mxu1 %v655_v2  ;;  %v213_v7 = vld [vmem:[%s994_s9 + $0x28] sm:$0xff]  ;;  %v215_v8 = vld [vmem:[%s994_s9 + $0x38] sm:$0xff]  ;;  %v217_v9 = vpack.c.bf16 %v211_v6, %v209_v5  ;;  %v210_v23 = vld [vmem:[%s994_s9 + $0x10] sm:$0xff]  ;;  %s204_s26 = scalar_lea.vmem [#allocation7], %s524_s4  ;;  %s1020_s27 = scalar_lea.hbm %s1069_s3, %s561_s25 }
  0x5a   : > { %v219_v10 = vpack.c.bf16 %v215_v8, %v213_v7  ;;  %v660_v11 = vld [vmem:[#allocation5 + $0x20] ss:$8 sps:$4 sm:$0xff]   ;;  %v661_v12 = vld [vmem:[#allocation5 + $0x34] ss:$8 sps:$4 sm:$0xff]   ;;  %v663_v13 = vld [vmem:[#allocation5 + $0x30] ss:$8 sps:$4 sm:$0xff]   ;;  %v216_v26 = vpack.c.bf16 %v210_v23, %v208_v22 }
  0x5b   : > { %355 = vmatprep.mubr.bf16.mxu0 %v217_v9  ;;  %v664_v14 = vld [vmem:[#allocation5 + $0x44] ss:$8 sps:$4 sm:$0xff]   ;;  %v666_v15 = vld [vmem:[#allocation5 + $0x40] ss:$8 sps:$4 sm:$0xff]   ;;  %v667_v16 = vld [vmem:[#allocation5 + $0x54] ss:$8 sps:$4 sm:$0xff]  }
  0x5c   : > { %363 = vmatprep.mubr.bf16.mxu1 %v219_v10  ;;  %v669_v17 = vld [vmem:[#allocation5 + $0x50] ss:$8 sps:$4 sm:$0xff]   ;;  %v670_v18 = vld [vmem:[#allocation5 + $0x64] ss:$8 sps:$4 sm:$0xff]   ;;  %v672_v19 = vld [vmem:[#allocation5 + $0x60] ss:$8 sps:$4 sm:$0xff]  }
  0x5d   : > { %v673_v20 = vld [vmem:[#allocation5 + $0x74] ss:$8 sps:$4 sm:$0xff]   ;;  %v675_v21 = vld [vmem:[#allocation5 + $0x70] ss:$8 sps:$4 sm:$0xff]   ;;  %v212_v24 = vld [vmem:[%s994_s9 + $0x20] sm:$0xff]  ;;  %s430_s5 = sshll.u32 %s204_s26, 4  ;;  %s1022_s5 = int_to_ptr.vmem [resolvable:$true] %s430_s5 }
  0x5e   : > { %v214_v25 = vld [vmem:[%s994_s9 + $0x30] sm:$0xff]  ;;  %v525_v28 = vld [vmem:[%s1068_s2] ss:$0 sm:$0xff]  ;;  %s417_s16 = scalar_lea.sflag [#allocation4], %s990_s6  ;;  %s750_s28 = scalar_lea.vmem %s1022_s5, 256 }
  0x5f   : > { %v218_v27 = vpack.c.bf16 %v214_v25, %v212_v24  ;;  %p751_p4 = scmp.ne.s32.totalorder %s1022_s5, %s750_s28  ;;  %s828_s29 = smov [#allocation7]  }
  0x60   : > { %326 = vmatpush1.bf16.xpose.msra.mxu0 %v657_v3  ;;  %582 = vmatpush1.bf16.xpose.msra.mxu1 %v657_v3  ;;  %s754_s23 = sshll.u32 %s828_s29, 4  ;;  %s755_s23 = int_to_ptr.vmem [resolvable:$false] %s754_s23 }
  0x61   : > { %327 = vmatprep.subr.bf16.mxu0 %v658_v4  ;;  %575 = vmatprep.subr.bf16.mxu1 %v658_v4  ;;  %p752_p6 = pnand %p751_p4, %p942_p12  ;;  %s756_s30 = scalar_lea.vmem %s755_s23, 512 }
  0x62   : > { %p757_p10 = scmp.lt.s32.totalorder %s1022_s5, %s755_s23  ;;  %p758_p13 = scmp.lt.s32.totalorder %s756_s30, %s750_s28 }
  0x63   : > { %p753_p8 = pneg %p752_p6 }
  0x64   : > { %p759_p3 = por %p758_p13, %p757_p10 }
  0x66   : > { %p760_p7 = pnand %p759_p3, %p753_p8 }
  0x68   : > { %328 = vmatpush1.bf16.xpose.msra.mxu0 %v660_v11  ;;  %583 = vmatpush1.bf16.xpose.msra.mxu1 %v660_v11 }
  0x69   : > { %329 = vmatprep.subr.bf16.mxu0 %v661_v12  ;;  %576 = vmatprep.subr.bf16.mxu1 %v661_v12 }
  0x70   : > { %330 = vmatpush1.bf16.xpose.msra.mxu0 %v663_v13  ;;  %584 = vmatpush1.bf16.xpose.msra.mxu1 %v663_v13 }
  0x71   : > { %331 = vmatprep.subr.bf16.mxu0 %v664_v14  ;;  %577 = vmatprep.subr.bf16.mxu1 %v664_v14 }
  0x78   : > { %332 = vmatpush1.bf16.xpose.msra.mxu0 %v666_v15  ;;  %585 = vmatpush1.bf16.xpose.msra.mxu1 %v666_v15 }
  0x79   : > { %333 = vmatprep.subr.bf16.mxu0 %v667_v16  ;;  %578 = vmatprep.subr.bf16.mxu1 %v667_v16 }
  0x80   : > { %334 = vmatpush1.bf16.xpose.msra.mxu0 %v669_v17  ;;  %586 = vmatpush1.bf16.xpose.msra.mxu1 %v669_v17 }
  0x81   : > { %335 = vmatprep.subr.bf16.mxu0 %v670_v18  ;;  %579 = vmatprep.subr.bf16.mxu1 %v670_v18 }
  0x88   : > { %336 = vmatpush1.bf16.xpose.msra.mxu0 %v672_v19  ;;  %587 = vmatpush1.bf16.xpose.msra.mxu1 %v672_v19 }
  0x89   : > { %337 = vmatprep.subr.bf16.mxu0 %v673_v20  ;;  %580 = vmatprep.subr.bf16.mxu1 %v673_v20 }
  0x90   : > { %338 = vmatpush1.bf16.xpose.msra.mxu0 %v675_v21  ;;  %588 = vmatpush1.bf16.xpose.msra.mxu1 %v675_v21 }
  0x97   : > { %356 = vmatmul.mubr.bf16.vlgmr.msra.gmra.mrb[0].mxu0 %v216_v26  ;;  %364 = vmatmul.mubr.bf16.vlgmr.msra.gmra.mrb[0].mxu1 %v218_v27 }
 0x16a   : > { %v357_v29 = vpop.f32.mrb[0].mxu0  ;;  %v365_v30 = vpop.f32.mrb[0].mxu1 }
 0x16b   : > { %v358_v31 = vadd.f32 %v525_v28, %v357_v29  ;;  %v366_v32 = vadd.f32 %v525_v28, %v365_v30  ;;  %v359_v33 = vpop.f32.mrb[1].mxu0  ;;  %v367_v34 = vpop.f32.mrb[1].mxu1 }
 0x16c   : > { %v360_v35 = vpop.f32.mrb[2].mxu0  ;;  %v368_v36 = vpop.f32.mrb[2].mxu1 }
 0x16d   : > { %v542_v37 = vmul.f32 -1.442695, %v358_v31  ;;  %v544_v38 = vmul.f32 -1.442695, %v366_v32  ;;  %v361_v39 = vadd.f32 %v525_v28, %v360_v35  ;;  %v369_v40 = vadd.f32 %v525_v28, %v368_v36  ;;  %v362_v41 = vpop.f32.mrb[3].mxu0  ;;  %v370_v42 = vpop.f32.mrb[3].mxu1 }
 0x16f   : > { %676 = vpow2.f32 %v542_v37  ;;  %v543_v43 = vmul.f32 -1.442695, %v361_v39  ;;  %v545_v44 = vmul.f32 -1.442695, %v369_v40 }
 0x170   : > { %678 = vpow2.f32 %v544_v38 }
 0x171   : > { %680 = vpow2.f32 %v543_v43 }
 0x172   : > { %682 = vpow2.f32 %v545_v44 }
 0x179   : > { %v677_v45 = vpop.eup %676 }
 0x17a   : > { %v679_v46 = vpop.eup %678  ;;  %v384_v47 = vadd.f32 1.0, %v677_v45 }
 0x17b   : > { %v681_v48 = vpop.eup %680  ;;  %v386_v49 = vadd.f32 1.0, %v679_v46 }
 0x17c   : > { %v683_v50 = vpop.eup %682  ;;  %684 = vrcp.f32 %v384_v47  ;;  %v385_v51 = vadd.f32 1.0, %v681_v48 }
 0x17d   : > { %686 = vrcp.f32 %v386_v49  ;;  %v387_v52 = vadd.f32 1.0, %v683_v50 }
 0x17e   : > { %688 = vrcp.f32 %v385_v51 }
 0x17f   : > { %690 = vrcp.f32 %v387_v52 }
 0x186   : > { %v685_v53 = vpop.eup %684 }
 0x187   : > { %v687_v54 = vpop.eup %686 }
 0x188   : > { %v689_v55 = vpop.eup %688 }
 0x189   : > { %v691_v56 = vpop.eup %690  ;;  %v565_v57 = vpack.c.bf16 %v689_v55, %v685_v53 }
 0x18a   : > { %v570_v58 = vpack.c.bf16 %v691_v56, %v687_v54 }
 0x18b   : > { %566 = vst [vmem:[%s204_s26] sm:$0xff] %v565_v57  }
 0x18c   : > { %572 = vst [vmem:[%s204_s26 + $0x8] sm:$0xff] %v570_v58  }
 0x18d   : > { %763 = shalt.err (!%p760_p7)
}
 0x18e   : > { %s764_s22 = scalar_lea.hbm %s1020_s27, 256  ;;  %s768_s9 = scalar_lea.hbm %s1069_s3, 512 }
 0x18f   : > { %p765_p9 = scmp.ne.s32.totalorder %s1020_s27, %s764_s22  ;;  %p769_p5 = scmp.lt.u32.totalorder %s1020_s27, %s1069_s3 }
 0x190   : > { %p770_p11 = scmp.lt.u32.totalorder %s768_s9, %s764_s22  ;;  %p772_p4 = scmp.lt.u32.totalorder %s764_s22, %s1020_s27 }
 0x191   : > { %p766_p2 = pnand %p765_p9, %p942_p12 }
 0x192   : > { %p771_p1 = por %p770_p11, %p769_p5 }
 0x193   : > { %p767_p0 = pneg %p766_p2 }
 0x194   : > { %p773_p6 = por %p772_p4, %p771_p1 }
 0x196   : > { %p774_p8 = pnand %p773_p6, %p767_p0 }
 0x198   : > { %777 = shalt.err (!%p774_p8)
}
 0x199   : > { %s829_s4 = smov 64   ;;  %s830_s25 = smov 4  }
 0x19a   : > { %595 = dma.vmem_to_hbm [thread:$0]  (%p942_p12), %s1022_s5, 256, %s1020_s27, %s417_s16, %s829_s4, %s829_s4, %s830_s25  }
 0x19b PF: > { %s445_s26 = sand.u32 1, %s808_s12   ;;  %p1084_p10 = scmp.ne.s32.totalorder %s1074_s19, 0 }
 0x19c   : > { %p1085_p13 = scmp.ge.s32.totalorder %s820_s15, 2  ;;  %s446_s10 = scalar_lea.sflag [#allocation4], %s445_s26 }
 0x19e   : > { %p606_p3 = pnand %p1085_p13, %p1084_p10 }
 0x1a0   : > { %803 = dma.done.wait (!%p606_p3), %s446_s10, 256  }
 0x1a1   : > { %805 = vsyncadd (!%p606_p3), %s446_s10, 4294967040  ;;  %p17_p7 = scmp.ge.s32.totalorder %s907_s24, 4   ;;  %s1086_s12 = smov %s812_s13 }
 0x1a2   : > { %s1087_s13 = smov %s816_s14  ;;  %s1088_s14 = smov %s938_s17 }
 0x1a3   : > { %s1089_s15 = smov %s907_s24  ;;  %19 = sbr.rel (!%p17_p7) target bundleno = 6 (0x6), region = 81 }
 0x1aa   :  { %451 = vsyncpa [#allocation3], 1 }
 0x1ab   :  { %453 = vsyncpa [#allocation3 + $0x1], 1 }
 0x1ac   :  { %454 = vsyncpa [#allocation6], 1 }
 0x1ad   :  { %455 = vsyncpa [#allocation4], 1 }
 0x1ae   :  { %457 = vsyncpa [#allocation4 + $0x1], 1 }

</bundles_post_ra>
